<compile_context>
chip_gen: v7x
topology: tpu7x:2x2x1
jax: 0.10.0
libtpu: 0.0.40
codegen_flags: <defaults>
</compile_context>

<pallas_src>
import math

import jax
import jax.numpy as jnp
from jax.experimental import pallas as pl
from jax.experimental.pallas import tpu as pltpu


def _head_kernel(x_ref, w1_ref, b1_ref, w2_ref, b2_ref, out_ref):
    # x_ref : (B, C*HW)      bf16    w1_ref: (C*HW, hidden) bf16    b1_ref: (1, hidden) f32
    # w2_ref: (hidden, out)  bf16    b2_ref: (1, out)       f32     out_ref: (B, out)   f32
    h = jnp.dot(x_ref[...], w1_ref[...],
                preferred_element_type=jnp.float32) + b1_ref[...]      # (B, hidden) f32
    h = jnp.maximum(h, 0.0)                                            # ReLU (VPU, f32)
    y = jnp.dot(h.astype(w2_ref.dtype), w2_ref[...],
                preferred_element_type=jnp.float32) + b2_ref[...]      # (B, out) f32
    out_ref[...] = y.astype(out_ref.dtype)


def classification_head(feat, w_pool, b_pool, w1, b1, w2, b2):
    """feat: (B, C, Hf, Wf) backbone feature map (NCHW). Returns (B, anchors*(classes+1)*2)."""
    B, C, Hf, Wf = feat.shape
    HW = Hf * Wf
    P = w_pool.shape[0]
    hidden, flat = w1.shape
    assert flat == P * HW
    out_dim = w2.shape[0]

    # ---- One-time weight preprocessing (plain XLA ops, outside the kernel). ----
    # Fold pool(1x1 conv) into the first Linear while preserving PyTorch's
    # flatten(start_dim=1) ordering (p, h, w):
    #   fea[b, p*HW+s] = sum_c w_pool[p,c]*feat[b,c,s] + b_pool[p]
    #   h[b,j] = sum_{c,s} W1_eff[j,c,s]*feat[b,c,s] + b1_eff[j]
    w1r = w1.reshape(hidden, P, HW)
    w1_eff = jnp.einsum("jps,pc->jcs", w1r, w_pool).reshape(hidden, C * HW)
    b1_eff = b1 + (w1r * b_pool[None, :, None]).sum(axis=(1, 2))

    # Pre-transpose (contraction on sublanes, lane-dense second RHS/output) and cast
    # the MXU operands to bf16; biases stay f32.
    w1_t = w1_eff.T.astype(jnp.bfloat16)                     # (C*HW, hidden)
    w2_t = w2.T.astype(jnp.bfloat16)                         # (hidden, out_dim)
    x2 = feat.reshape(B, C * HW).astype(jnp.bfloat16)        # NCHW flatten, (c, h, w) order
    b1r = b1_eff.reshape(1, hidden).astype(jnp.float32)
    b2r = b2.reshape(1, out_dim).astype(jnp.float32)

    flops = 2 * B * (C * HW * hidden + hidden * out_dim)
    bytes_accessed = (2 * (x2.size + w1_t.size + w2_t.size)
                      + 4 * (b1r.size + b2r.size + B * out_dim))

    vmem = pl.BlockSpec(memory_space=pltpu.MemorySpace.VMEM)
    return pl.pallas_call(
        _head_kernel,
        out_shape=jax.ShapeDtypeStruct((B, out_dim), feat.dtype),
        in_specs=[vmem] * 5,
        out_specs=vmem,
        cost_estimate=pl.CostEstimate(flops=flops, transcendentals=0,
                                      bytes_accessed=bytes_accessed),
    )(x2, w1_t, b1r, w2_t, b2r)


if __name__ == "__main__":
    # Hyperparameters consistent with ClassificationNet.__init__
    input_shape = (3, 32, 32)       # (C, H, W) image fed to the backbone
    reduction_factor = 8            # backbone.reduction_factor
    backbone_out_channels = 16      # backbone.out_channels[-1]
    anchors, classes = 8, 7
    pool_channels = 8
    fc_hidden_size = 32
    B = 8                           # fills a full sublane group in the (B, 128) output

    Hf = math.ceil(input_shape[1] / reduction_factor)   # 4
    Wf = math.ceil(input_shape[2] / reduction_factor)   # 4
    flat_dim = pool_channels * Hf * Wf                  # 128
    out_dim = anchors * (classes + 1) * 2               # 128

    key = jax.random.PRNGKey(0)
    k = jax.random.split(key, 7)

    # TODO(synk): ResNet/EfficientNet backbone is an external module not defined in the
    # given source; we feed its (B, C, Hf, Wf) output feature map directly to the head.
    feat = jax.random.normal(k[0], (B, backbone_out_channels, Hf, Wf), jnp.float32)

    # Deterministic synthetic parameters (shapes match nn.Conv2d(k=1) / nn.Linear).
    w_pool = jax.random.normal(k[1], (pool_channels, backbone_out_channels), jnp.float32) * 0.10
    b_pool = jax.random.normal(k[2], (pool_channels,), jnp.float32) * 0.10
    w1 = jax.random.normal(k[3], (fc_hidden_size, flat_dim), jnp.float32) * 0.05
    b1 = jax.random.normal(k[4], (fc_hidden_size,), jnp.float32) * 0.05
    w2 = jax.random.normal(k[5], (out_dim, fc_hidden_size), jnp.float32) * 0.05
    b2 = jax.random.normal(k[6], (out_dim,), jnp.float32) * 0.05

    clf = classification_head(feat, w_pool, b_pool, w1, b1, w2, b2)
    clf = jax.block_until_ready(clf)

    # Pure-JAX f32 reference with exact PyTorch semantics
    # (1x1 conv NCHW, flatten(start_dim=1), Linear -> ReLU -> Linear).
    pooled_ref = jnp.einsum("pc,bchw->bphw", w_pool, feat) + b_pool[None, :, None, None]
    fea_ref = pooled_ref.reshape(B, -1)
    h_ref = jnp.maximum(fea_ref @ w1.T + b1, 0.0)
    clf_ref = h_ref @ w2.T + b2

    assert clf.shape == (B, out_dim), clf.shape
    # bf16 MXU inputs (f32 accumulation) vs. f32 reference -> ~1e-2 tolerance.
    assert jnp.allclose(clf, clf_ref, atol=2e-2, rtol=2e-2), float(jnp.max(jnp.abs(clf - clf_ref)))
    print("KERNEL_OK")
</pallas_src>

<mosaic_0001>
module attributes {stable_mosaic.version = 11 : i64} {
  func.func @_head_kernel(%arg0: memref<8x256xbf16, #tpu.memory_space<vmem>>, %arg1: memref<256x32xbf16, #tpu.memory_space<vmem>>, %arg2: memref<1x32xf32, #tpu.memory_space<vmem>>, %arg3: memref<32x128xbf16, #tpu.memory_space<vmem>>, %arg4: memref<1x128xf32, #tpu.memory_space<vmem>>, %arg5: memref<8x128xf32, #tpu.memory_space<vmem>>) attributes {dimension_semantics = [], scalar_prefetch = 0 : i64, scratch_operands = 0 : i64, tpu.core_type = #tpu.core_type<tc>} {
    %c0 = arith.constant 0 : index
    %c0_0 = arith.constant 0 : index
    %0 = vector.load %arg0[%c0, %c0_0] : memref<8x256xbf16, #tpu.memory_space<vmem>>, vector<8x256xbf16>
    %c0_1 = arith.constant 0 : index
    %c0_2 = arith.constant 0 : index
    %1 = vector.load %arg1[%c0_1, %c0_2] : memref<256x32xbf16, #tpu.memory_space<vmem>>, vector<256x32xbf16>
    %cst = arith.constant dense<0.000000e+00> : vector<8x32xf32>
    %2 = tpu.matmul %0, %1, %cst {dimension_numbers = #tpu.dot_dimension_numbers<[1], [0], [0], [1], [0, 0, 1, 1], [], []>} : vector<8x256xbf16>, vector<256x32xbf16>, vector<8x32xf32> -> vector<8x32xf32>
    %c0_3 = arith.constant 0 : index
    %c0_4 = arith.constant 0 : index
    %3 = vector.load %arg2[%c0_3, %c0_4] : memref<1x32xf32, #tpu.memory_space<vmem>>, vector<1x32xf32>
    %4 = vector.broadcast %3 : vector<1x32xf32> to vector<8x32xf32>
    %5 = arith.addf %2, %4 : vector<8x32xf32>
    %cst_5 = arith.constant 0.000000e+00 : f32
    %6 = vector.broadcast %cst_5 : f32 to vector<8x32xf32>
    %7 = arith.maximumf %5, %6 : vector<8x32xf32>
    %8 = arith.truncf %7 : vector<8x32xf32> to vector<8x32xbf16>
    %c0_6 = arith.constant 0 : index
    %c0_7 = arith.constant 0 : index
    %9 = vector.load %arg3[%c0_6, %c0_7] : memref<32x128xbf16, #tpu.memory_space<vmem>>, vector<32x128xbf16>
    %cst_8 = arith.constant dense<0.000000e+00> : vector<8x128xf32>
    %10 = tpu.matmul %8, %9, %cst_8 {dimension_numbers = #tpu.dot_dimension_numbers<[1], [0], [0], [1], [0, 0, 1, 1], [], []>} : vector<8x32xbf16>, vector<32x128xbf16>, vector<8x128xf32> -> vector<8x128xf32>
    %c0_9 = arith.constant 0 : index
    %c0_10 = arith.constant 0 : index
    %11 = vector.load %arg4[%c0_9, %c0_10] : memref<1x128xf32, #tpu.memory_space<vmem>>, vector<1x128xf32>
    %12 = vector.broadcast %11 : vector<1x128xf32> to vector<8x128xf32>
    %13 = arith.addf %10, %12 : vector<8x128xf32>
    %c0_11 = arith.constant 0 : index
    %c0_12 = arith.constant 0 : index
    %14 = vector.load %arg5[%c0_11, %c0_12] : memref<8x128xf32, #tpu.memory_space<vmem>>, vector<8x128xf32>
    tpu.vector_store %arg5[%c0_11, %c0_12], %13 {strides = array<i32>} : memref<8x128xf32, #tpu.memory_space<vmem>>, vector<8x128xf32>,
    return
  }
}

</mosaic_0001>

<bundles_post_ra>
// kernel: tpu_custom_call.1
= control target key start
LH: loop header
LB: loop body
LE: loop exit
PB: predicated region body
PF: predicated region fallthrough
CT: control target
= control target key end

     0   :  { %s500_s0 = inlined_call_operand.vmem [shape: bf16[8,256], index: 0, kind: input, shape index: {}]   ;;  %s501_s1 = inlined_call_operand.vmem [shape: bf16[256,32], index: 1, kind: input, shape index: {}]   ;;  %s502_s2 = inlined_call_operand.vmem [shape: f32[1,32], index: 2, kind: input, shape index: {}]   ;;  %s503_s3 = inlined_call_operand.vmem [shape: bf16[32,128], index: 3, kind: input, shape index: {}]   ;;  %s504_s4 = inlined_call_operand.vmem [shape: f32[1,128], index: 4, kind: input, shape index: {}]   ;;  %s505_s5 = inlined_call_operand.hbm [shape: f32[8,128], index: 5, kind: output, shape index: {}]  }
   0x1   :  { %v348_v0 = vld [vmem:[%s501_s1 + $0x40] sm:$0xff]   ;;  %v350_v2 = vld [vmem:[%s501_s1 + $0x48] sm:$0xff]   ;;  %v352_v4 = vld [vmem:[%s501_s1 + $0x50] sm:$0xff]  }
   0x2   :  { %v349_v1 = vld [vmem:[%s501_s1] sm:$0xff]   ;;  %312 = vmatprep.subr.bf16.mxu0 %v348_v0  ;;  %v351_v3 = vld [vmem:[%s501_s1 + $0x8] sm:$0xff]   ;;  %v353_v5 = vld [vmem:[%s501_s1 + $0x10] sm:$0xff]  }
   0x3   :  { %313 = vmatpush3.bf16.msra.mxu0 %v349_v1  ;;  %v354_v6 = vld [vmem:[%s501_s1 + $0x58] sm:$0xff]   ;;  %v356_v8 = vld [vmem:[%s501_s1 + $0x60] sm:$0xff]   ;;  %v358_v10 = vld [vmem:[%s501_s1 + $0x68] sm:$0xff]  }
   0x4   :  { %314 = vmatprep.subr.bf16.mxu0 %v350_v2  ;;  %v355_v7 = vld [vmem:[%s501_s1 + $0x18] sm:$0xff]   ;;  %v357_v9 = vld [vmem:[%s501_s1 + $0x20] sm:$0xff]  }
   0x5   :  { %v22_v11 = vld [vmem:[%s500_s0] sm:$0xff] }
   0x6   :  { %v291_v12 = vcombine.high %v22_v11, %v22_v11 }
   0x7   :  { %315 = vmatpush3.bf16.msra.mxu0 %v351_v3 }
   0x8   :  { %316 = vmatprep.subr.bf16.mxu0 %v352_v4 }
   0xb   :  { %317 = vmatpush3.bf16.msra.mxu0 %v353_v5 }
   0xc   :  { %318 = vmatprep.subr.bf16.mxu0 %v354_v6 }
   0xf   :  { %319 = vmatpush3.bf16.msra.mxu0 %v355_v7 }
  0x10   :  { %320 = vmatprep.subr.bf16.mxu0 %v356_v8 }
  0x11   :  { %10 = vsyncpa [#allocation3], 0  ;;  %v359_v13 = vld [vmem:[%s501_s1 + $0x28] sm:$0xff]   ;;  %197 = vmatprep.mubr.bf16.mxu0 %v291_v12  ;;  %v360_v14 = vld [vmem:[%s501_s1 + $0x70] sm:$0xff]   ;;  %v290_v18 = vcombine.low %v22_v11, %v22_v11  ;;  %v392_v20 = vmov 0.0   ;;  %vm393_vm0 = vmmov 0  }
  0x12   :  { %v361_v15 = vld [vmem:[%s501_s1 + $0x30] sm:$0xff]   ;;  %v362_v16 = vld [vmem:[%s501_s1 + $0x78] sm:$0xff]   ;;  %v366_v19 = vld [vmem:[%s503_s3] sm:$0xff]   ;;  %337 = vmatprep.subr.bf16.mxu1 %v392_v20  ;;  %341 = vmatprep.mubr.msk.bf16.mxu1 %vm393_vm0, %v392_v20  ;;  %vm230_vm1 = vcmask 261120  }
  0x13   :  { %321 = vmatpush3.bf16.msra.mxu0 %v357_v9  ;;  %v363_v17 = vld [vmem:[%s501_s1 + $0x38] sm:$0xff]   ;;  %338 = vmatpush3.bf16.msra.mxu1 %v366_v19  ;;  %v367_v21 = vld [vmem:[%s503_s3 + $0x8] sm:$0xff]   ;;  %v289_v23 = vld [vmem:[%s502_s2] ss:$0 sm:$0xff]  ;;  %s394_s3 = smov [#allocation2]  }
  0x14   :  { %322 = vmatprep.subr.bf16.mxu0 %v358_v10  ;;  %339 = vmatprep.subr.bf16.mxu1 %v392_v20  ;;  %v308_v31 = vld [vmem:[%s504_s4] ss:$0 sm:$0xff]  ;;  %s281_s8 = sshll.u32 %s394_s3, 4  ;;  %s282_s8 = int_to_ptr.vmem [resolvable:$true] %s281_s8 }
  0x15   :  { %s368_s2 = scalar_lea.vmem %s282_s8, 128  ;;  %p373_p1 = scmp.lt.s32.totalorder %s282_s8, %s282_s8 }
  0x16   :  { %p369_p0 = scmp.ne.s32.totalorder %s282_s8, %s368_s2  ;;  %p374_p2 = scmp.lt.s32.totalorder %s368_s2, %s368_s2 }
  0x17   :  { %323 = vmatpush3.bf16.msra.mxu0 %v359_v13  ;;  %340 = vmatpush3.bf16.msra.mxu1 %v367_v21 }
  0x18   :  { %324 = vmatprep.subr.bf16.mxu0 %v360_v14  ;;  %p375_p3 = por %p374_p2, %p373_p1 }
  0x1a   :  { %p376_p4 = pnand %p375_p3, %p369_p0 }
  0x1b   :  { %325 = vmatpush3.bf16.msra.mxu0 %v361_v15 }
  0x1c   :  { %326 = vmatprep.subr.bf16.mxu0 %v362_v16 }
  0x1f   :  { %327 = vmatpush3.bf16.msra.mxu0 %v363_v17 }
  0x22   :  { %198 = vmatmul.mubr.bf16.vlgmr.msra.gmra.mrb[0].mxu0 %v290_v18 }
  0xf5   :  { %v328_v22 = vpop.f32.mrb[0].mxu0 }
  0xf6   :  { %v329_v24 = vpop.f32.mrb[1].mxu0 }
  0xf7   :  { %v330_v25 = vadd.f32 %v329_v24, %v328_v22  ;;  %v331_v26 = vpop.f32.mrb[2].mxu0 }
  0xf8   :  { %v332_v27 = vpop.f32.mrb[3].mxu0 }
  0xf9   :  { %v200_v28 = vadd.f32 %v330_v25, %v289_v23 }
  0xfb   :  { %v205_v29 = vmax.f32 %v200_v28, 0.0 }
  0xfd   :  { %v206_v30 = vpack.c.bf16 %v205_v29, %v205_v29 }
  0xff   :  { %342 = vmatmul.mubr.msk.bf16.vlgmr.msra.gmra.mrb[0].mxu1 %vm230_vm1, %v206_v30 }
 0x1d2   :  { %v268_v32 = vpop.f32.mrb[0].mxu1 }
 0x1d3   :  { %v269_v33 = vadd.f32 %v308_v31, %v268_v32  ;;  %v343_v34 = vpop.f32.mrb[1].mxu1 }
 0x1d4   :  { %v271_v35 = vpop.f32.mrb[2].mxu1 }
 0x1d5   :  { %274 = vst [vmem:[#allocation2] sm:$0xff] %v269_v33  ;;  %v344_v36 = vpop.f32.mrb[3].mxu1 }
 0x1d6   :  { %379 = shalt.err (!%p376_p4)
}
 0x1d7   :  { %s380_s4 = scalar_lea.hbm %s505_s5, 128 }
 0x1d8   :  { %p381_p5 = scmp.ne.s32.totalorder %s505_s5, %s380_s4  ;;  %p384_p6 = scmp.lt.u32.totalorder %s380_s4, %s505_s5 }
 0x1da   :  { %p386_p7 = pnand %p384_p6, %p381_p5 }
 0x1dc   :  { %389 = shalt.err (!%p386_p7)
}
 0x1dd   :  { %284 = dma.vmem_to_hbm [thread:$0]  %s282_s8, 128, %s505_s5, [#allocation3]  }
 0x1de   :  { %390 = dma.done.wait [#allocation3], 128  }
 0x1df   :  { %391 = vsyncadd [#allocation3], 4294967168 }
 0x1e0   :  { %288 = vsyncpa [#allocation3], 1 }

</bundles_post_ra>
